<compile_context>
chip_gen: v6e
topology: v6e:2x2x1
jax: 0.10.0
libtpu: 0.0.40
codegen_flags: <defaults>
</compile_context>

<pallas_src>
import functools

import jax
import jax.numpy as jnp
from jax import lax
from jax.experimental import pallas as pl
from jax.experimental.pallas import tpu as pltpu


def _dropout_kernel(threshold24, scale, seed_ref, x_ref, y_ref):
    """seed_ref: (1,) int32 in SMEM; x_ref / y_ref: (TR, W) blocks."""
    tr, w = x_ref.shape

    # Global linear element index of every element in this block.
    row = lax.broadcasted_iota(jnp.int32, (tr, w), 0).astype(jnp.uint32)
    col = lax.broadcasted_iota(jnp.int32, (tr, w), 1).astype(jnp.uint32)
    base = (pl.program_id(0) * tr).astype(jnp.uint32)
    idx = (base + row) * jnp.uint32(w) + col

    # Counter-based hash: idx + seed*golden, then murmur3 fmix32 avalanche.
    seed_u = seed_ref[0].astype(jnp.uint32)
    h = idx + seed_u * jnp.uint32(0x9E3779B9)
    h = h ^ (h >> 16)
    h = h * jnp.uint32(0x85EBCA6B)
    h = h ^ (h >> 13)
    h = h * jnp.uint32(0xC2B2AE35)
    h = h ^ (h >> 16)

    # keep where uniform24 > p  (matches torch: mask = rand > p)
    keep = (h >> 8).astype(jnp.int32) > jnp.int32(threshold24)

    x = x_ref[...]
    scaled = x * jnp.asarray(scale, dtype=x.dtype)
    y_ref[...] = jnp.where(keep, scaled, jnp.zeros_like(scaled)).astype(y_ref.dtype)


def _choose_2d_shape(shape):
    """Flatten to (rows, W) with W a wide multiple of 128 when possible."""
    total = 1
    for d in shape:
        total *= d
    for w in (4096, 2048, 1024, 512, 256, 128):
        if total % w == 0:
            return total // w, w
    # Fallback: keep the original feature axis last (full-dim block is legal).
    if len(shape) == 1:
        return 1, shape[0]
    c = shape[-1]
    return total // c, c


def dropout_forward(x, p=0.5, seed=0, training=True):
    """Dropout forward pass (training uses an in-kernel counter-based PRNG)."""
    if not training or p == 0.0:
        return x
    if p >= 1.0:
        return jnp.zeros_like(x)

    orig_shape = x.shape
    rows, w = _choose_2d_shape(orig_shape)
    x2 = x.reshape(rows, w)

    itemsize = jnp.dtype(x.dtype).itemsize
    sub = {4: 8, 2: 16, 1: 32}.get(itemsize, 8)   # sublane packing per dtype

    # ~1 MiB per input tile -> 2 specs x 2 pipeline buffers = ~4 MiB, safe on
    # every generation (v5e 16 MiB scoped default, v7x 64 MiB physical VMEM).
    budget_bytes = 1 * 1024 * 1024
    max_rows = max(sub, (budget_bytes // max(1, w * itemsize)) // sub * sub)

    if rows > max_rows:
        tr = max_rows
    elif rows > sub:
        # Split into >= 2 grid steps so v7x's two TensorCores both get work.
        half = (rows + 1) // 2
        tr = ((half + sub - 1) // sub) * sub
    else:
        tr = rows                                  # full-extent block (legal)
    grid = (pl.cdiv(rows, tr),)

    scale = 1.0 / (1.0 - p)
    threshold24 = int(p * (1 << 24))
    kernel = functools.partial(_dropout_kernel, threshold24, float(scale))
    seed_arr = jnp.array([seed], dtype=jnp.int32)

    grid_spec = pltpu.PrefetchScalarGridSpec(
        num_scalar_prefetch=1,
        grid=grid,
        # index_maps receive (grid idx, *prefetch refs)
        in_specs=[pl.BlockSpec((tr, w), lambda i, seed_ref: (i, 0))],
        out_specs=pl.BlockSpec((tr, w), lambda i, seed_ref: (i, 0)),
    )

    nbytes = rows * w * itemsize
    y2 = pl.pallas_call(
        kernel,
        grid_spec=grid_spec,
        out_shape=jax.ShapeDtypeStruct((rows, w), x.dtype),
        compiler_params=pltpu.CompilerParams(
            dimension_semantics=("parallel",),
            vmem_limit_bytes=32 * 1024 * 1024,
        ),
        cost_estimate=pl.CostEstimate(
            flops=10 * rows * w, transcendentals=0, bytes_accessed=2 * nbytes),
    )(seed_arr, x2)

    return y2.reshape(orig_shape)


if __name__ == "__main__":
    key = jax.random.PRNGKey(0)
    batch, seq, hidden = 2, 8, 128      # small MLP-style activation
    p = 0.5

    x = jax.random.normal(key, (batch, seq, hidden), dtype=jnp.float32)

    # Training mode.
    y = dropout_forward(x, p=p, seed=42, training=True)
    jax.block_until_ready(y)

    scale = 1.0 / (1.0 - p)
    # Every output element must be either exactly dropped (0) or x / (1 - p).
    kept = jnp.abs(y) > 0
    ok_values = jnp.where(kept, jnp.isclose(y, x * scale, rtol=1e-5, atol=1e-6),
                          True)
    assert bool(jnp.all(ok_values)), "output values not in {0, x/(1-p)}"

    # Keep fraction should be ~ (1 - p); very loose statistical bound.
    keep_frac = float(jnp.mean(kept.astype(jnp.float32)))
    assert 0.35 < keep_frac < 0.65, f"keep fraction off: {keep_frac}"

    # Determinism for a fixed seed.
    y2 = dropout_forward(x, p=p, seed=42, training=True)
    assert bool(jnp.all(y == y2)), "same seed must give identical mask"

    # Different seed should give a different mask (overwhelmingly likely).
    y3 = dropout_forward(x, p=p, seed=7, training=True)
    assert not bool(jnp.all(y == y3)), "different seeds gave identical mask"

    # Eval mode is identity.
    y_eval = dropout_forward(x, p=p, seed=42, training=False)
    assert bool(jnp.all(y_eval == x)), "eval mode must be identity"

    print("KERNEL_OK")
</pallas_src>

<mosaic_0001>
module attributes {stable_mosaic.version = 11 : i64} {
  func.func @_dropout_kernel(%arg0: i32, %arg1: memref<1xi32, #tpu.memory_space<smem>>, %arg2: memref<1x2048xf32, #tpu.memory_space<vmem>>, %arg3: memref<1x2048xf32, #tpu.memory_space<vmem>>) attributes {dimension_semantics = [#tpu.dimension_semantics<parallel>], iteration_bounds = array<i64: 1>, scalar_prefetch = 1 : i64, scratch_operands = 0 : i64, tpu.core_type = #tpu.core_type<tc>, window_params = [{transform_indices = @transform_0, window_bounds = array<i64: 1, 2048>}, {transform_indices = @transform_1, window_bounds = array<i64: 1, 2048>}]} {
    %0 = tpu.iota {dimensions = array<i32: 0>} : vector<1x2048xi32>
    %1 = tpu.iota {dimensions = array<i32: 1>} : vector<1x2048xi32>
    %c1_i32 = arith.constant 1 : i32
    %2 = arith.muli %arg0, %c1_i32 : i32
    %3 = vector.broadcast %2 : i32 to vector<1x2048xi32>
    %4 = arith.addi %3, %0 : vector<1x2048xi32>
    %c2048_i32 = arith.constant 2048 : i32
    %5 = vector.broadcast %c2048_i32 : i32 to vector<1x2048xi32>
    %6 = arith.muli %4, %5 : vector<1x2048xi32>
    %7 = arith.addi %6, %1 : vector<1x2048xi32>
    %c0 = arith.constant 0 : index
    %8 = memref.load %arg1[%c0] : memref<1xi32, #tpu.memory_space<smem>>
    %c-1640531527_i32 = arith.constant -1640531527 : i32
    %9 = arith.muli %8, %c-1640531527_i32 : i32
    %10 = vector.broadcast %9 : i32 to vector<1x2048xi32>
    %11 = arith.addi %7, %10 : vector<1x2048xi32>
    %c16_i32 = arith.constant 16 : i32
    %12 = vector.broadcast %c16_i32 : i32 to vector<1x2048xi32>
    %13 = arith.shrui %11, %12 : vector<1x2048xi32>
    %14 = arith.xori %11, %13 : vector<1x2048xi32>
    %c-2048144789_i32 = arith.constant -2048144789 : i32
    %15 = vector.broadcast %c-2048144789_i32 : i32 to vector<1x2048xi32>
    %16 = arith.muli %14, %15 : vector<1x2048xi32>
    %c13_i32 = arith.constant 13 : i32
    %17 = vector.broadcast %c13_i32 : i32 to vector<1x2048xi32>
    %18 = arith.shrui %16, %17 : vector<1x2048xi32>
    %19 = arith.xori %16, %18 : vector<1x2048xi32>
    %c-1028477387_i32 = arith.constant -1028477387 : i32
    %20 = vector.broadcast %c-1028477387_i32 : i32 to vector<1x2048xi32>
    %21 = arith.muli %19, %20 : vector<1x2048xi32>
    %c16_i32_0 = arith.constant 16 : i32
    %22 = vector.broadcast %c16_i32_0 : i32 to vector<1x2048xi32>
    %23 = arith.shrui %21, %22 : vector<1x2048xi32>
    %24 = arith.xori %21, %23 : vector<1x2048xi32>
    %c8_i32 = arith.constant 8 : i32
    %25 = vector.broadcast %c8_i32 : i32 to vector<1x2048xi32>
    %26 = arith.shrui %24, %25 : vector<1x2048xi32>
    %c8388608_i32 = arith.constant 8388608 : i32
    %27 = vector.broadcast %c8388608_i32 : i32 to vector<1x2048xi32>
    %28 = arith.cmpi sgt, %26, %27 : vector<1x2048xi32>
    %c0_1 = arith.constant 0 : index
    %c0_2 = arith.constant 0 : index
    %29 = vector.load %arg2[%c0_1, %c0_2] : memref<1x2048xf32, #tpu.memory_space<vmem>>, vector<1x2048xf32>
    %cst = arith.constant 2.000000e+00 : f32
    %30 = vector.broadcast %cst : f32 to vector<1x2048xf32>
    %31 = arith.mulf %29, %30 : vector<1x2048xf32>
    %cst_3 = arith.constant 0.000000e+00 : f32
    %32 = vector.broadcast %cst_3 : f32 to vector<1x2048xf32>
    %33 = arith.select %28, %31, %32 : vector<1x2048xi1>, vector<1x2048xf32>
    %c0_4 = arith.constant 0 : index
    %c0_5 = arith.constant 0 : index
    %34 = vector.load %arg3[%c0_4, %c0_5] : memref<1x2048xf32, #tpu.memory_space<vmem>>, vector<1x2048xf32>
    tpu.vector_store %arg3[%c0_4, %c0_5], %33 {strides = array<i32>} : memref<1x2048xf32, #tpu.memory_space<vmem>>, vector<1x2048xf32>,
    return
  }
  func.func @transform_0(%arg0: i32, %arg1: memref<1xi32, #tpu.memory_space<smem>>) -> (i32, i32) {
    %c0_i32 = arith.constant 0 : i32
    %c0_i32_0 = arith.constant 0 : i32
    return %arg0, %c0_i32 : i32, i32
  }
  func.func @transform_1(%arg0: i32, %arg1: memref<1xi32, #tpu.memory_space<smem>>) -> (i32, i32) {
    %c0_i32 = arith.constant 0 : i32
    %c0_i32_0 = arith.constant 0 : i32
    return %arg0, %c0_i32 : i32, i32
  }
}

</mosaic_0001>

<bundles_post_ra>
// kernel: tpu_custom_call.1
= control target key start
LH: loop header
LB: loop body
LE: loop exit
PB: predicated region body
PF: predicated region fallthrough
CT: control target
= control target key end

     0   :  { %8 = vsyncpa [#allocation5], 0  ;;  %s718_s0 = inlined_call_operand.<no memory space> [shape: s32[1], index: 0, kind: input, shape index: {}]   ;;  %s719_s1 = inlined_call_operand.hbm [shape: f32[1,2048], index: 1, kind: input, shape index: {}]   ;;  %s720_s2 = inlined_call_operand.hbm [shape: f32[1,2048], index: 2, kind: output, shape index: {}]  }
   0x1   :  { %9 = vsyncpa [#allocation6], 0  ;;  %s522_s9 = smov [#allocation4]  }
   0x2   :  { %s16_s10 = sshll.u32 %s522_s9, 4  ;;  %s17_s10 = int_to_ptr.vmem [resolvable:$true] %s16_s10 }
   0x3   :  { %s486_s11 = scalar_lea.vmem %s17_s10, 256  ;;  %p491_p1 = scmp.lt.s32.totalorder %s17_s10, %s17_s10 }
   0x4   :  { %p487_p0 = scmp.ne.s32.totalorder %s17_s10, %s486_s11  ;;  %p492_p2 = scmp.lt.s32.totalorder %s486_s11, %s486_s11 }
   0x6   :  { %p493_p3 = por %p492_p2, %p491_p1 }
   0x8   :  { %p494_p4 = pnand %p493_p3, %p487_p0 }
   0xa   :  { %497 = shalt.err (!%p494_p4)
}
   0xb   :  { %19 = dma.hbm_to_vmem [thread:$0]  %s719_s1, 256, %s17_s10, [#allocation5]  }
   0xc   :  { %518 = dma.done.wait [#allocation5], 256  }
   0xd   :  { %519 = vsyncadd [#allocation5], 4294967040  ;;  %v23_v0 = vlaneseq  ;;  %s62_s16 = smul.u32 2654435769, %s718_s0  ;;  %v523_v1 = vmov 1966171168  }
   0xe   :  { %v546_v2 = vunpack.c.l.s4 %v523_v1  ;;  %v240_v23 = vld [vmem:[#allocation4] sm:$0xff]  ;;  %v241_v24 = vld [vmem:[#allocation4 + $0x8] sm:$0xff]  ;;  %s524_s0 = smov [#allocation7]  }
   0xf   :  { %v26_v3 = vand.u32 127, %v23_v0  ;;  %v548_v4 = vshrl.u32 %v23_v0, 7  ;;  %v63_v5 = vstv %s62_s16  ;;  %v552_v25 = vmul.f32 2.0, %v240_v23  ;;  %s466_s1 = sshll.u32 %s524_s0, 4  ;;  %s467_s1 = int_to_ptr.vmem [resolvable:$true] %s466_s1 }
  0x10   :  { %v554_v26 = vmul.f32 2.0, %v241_v24  ;;  %s498_s17 = scalar_lea.vmem %s467_s1, 256  ;;  %p503_p6 = scmp.lt.s32.totalorder %s467_s1, %s467_s1 }
  0x11   :  { %v27_v7 = vadd.s32 128, %v26_v3  ;;  %v28_v8 = vadd.s32 256, %v26_v3  ;;  %v29_v9 = vadd.s32 384, %v26_v3  ;;  %v30_v10 = vadd.s32 512, %v26_v3  ;;  %p499_p5 = scmp.ne.s32.totalorder %s467_s1, %s498_s17  ;;  %p504_p7 = scmp.lt.s32.totalorder %s498_s17, %s498_s17 }
  0x12   :  { %v31_v11 = vadd.s32 640, %v26_v3  ;;  %v32_v12 = vadd.s32 768, %v26_v3  ;;  %v33_v13 = vadd.s32 896, %v26_v3  ;;  %v34_v14 = vadd.s32 1024, %v26_v3 }
  0x13   :  { %v35_v15 = vadd.s32 1152, %v26_v3  ;;  %v36_v16 = vadd.s32 1280, %v26_v3  ;;  %v37_v17 = vadd.s32 1408, %v26_v3  ;;  %v38_v18 = vadd.s32 1536, %v26_v3  ;;  %p505_p8 = por %p504_p7, %p503_p6 }
  0x14   :  { %v39_v19 = vadd.s32 1664, %v26_v3  ;;  %v40_v20 = vadd.s32 1792, %v26_v3  ;;  %v41_v21 = vadd.s32 1920, %v26_v3  ;;  %v44_v22 = vmul.u32 2048, %v548_v4 }
  0x15   :  { %v248_v27 = vsub.s32 0, %v548_v4  ;;  %v252_v28 = vsub.s32 1, %v548_v4  ;;  %p506_p9 = pnand %p505_p8, %p499_p5 }
  0x16   :  { %v45_v29 = vadd.s32 %v44_v22, %v26_v3  ;;  %v46_v30 = vadd.s32 %v44_v22, %v27_v7  ;;  %v47_v31 = vadd.s32 %v44_v22, %v28_v8  ;;  %v48_v32 = vadd.s32 %v44_v22, %v29_v9 }
  0x17   :  { %v49_v33 = vadd.s32 %v44_v22, %v30_v10  ;;  %v50_v34 = vadd.s32 %v44_v22, %v31_v11  ;;  %v51_v35 = vadd.s32 %v44_v22, %v32_v12  ;;  %v52_v36 = vadd.s32 %v44_v22, %v33_v13 }
  0x18   :  { %v53_v37 = vadd.s32 %v44_v22, %v34_v14  ;;  %v54_v38 = vadd.s32 %v44_v22, %v35_v15  ;;  %v55_v39 = vadd.s32 %v44_v22, %v36_v16  ;;  %v56_v40 = vadd.s32 %v44_v22, %v37_v17 }
  0x19   :  { %v57_v41 = vadd.s32 %v44_v22, %v38_v18  ;;  %v58_v42 = vadd.s32 %v44_v22, %v39_v19  ;;  %v59_v43 = vadd.s32 %v44_v22, %v40_v20  ;;  %v60_v44 = vadd.s32 %v44_v22, %v41_v21 }
  0x1a   :  { %v64_v45 = vadd.s32 %v63_v5, %v45_v29  ;;  %v65_v46 = vadd.s32 %v63_v5, %v46_v30  ;;  %v66_v47 = vadd.s32 %v63_v5, %v47_v31  ;;  %v67_v48 = vadd.s32 %v63_v5, %v48_v32 }
  0x1b   :  { %v68_v49 = vadd.s32 %v63_v5, %v49_v33  ;;  %v69_v50 = vadd.s32 %v63_v5, %v50_v34  ;;  %v70_v51 = vadd.s32 %v63_v5, %v51_v35  ;;  %v71_v52 = vadd.s32 %v63_v5, %v52_v36 }
  0x1c   :  { %v72_v53 = vadd.s32 %v63_v5, %v53_v37  ;;  %v73_v54 = vadd.s32 %v63_v5, %v54_v38  ;;  %v74_v55 = vadd.s32 %v63_v5, %v55_v39  ;;  %v75_v56 = vadd.s32 %v63_v5, %v56_v40 }
  0x1d   :  { %v76_v57 = vadd.s32 %v63_v5, %v57_v41  ;;  %v77_v58 = vadd.s32 %v63_v5, %v58_v42  ;;  %v78_v59 = vadd.s32 %v63_v5, %v59_v43  ;;  %v79_v60 = vadd.s32 %v63_v5, %v60_v44 }
  0x1e   :  { %v80_v61 = vshrl.u32 %v64_v45, 16  ;;  %v81_v62 = vshrl.u32 %v65_v46, 16  ;;  %v82_v63 = vshrl.u32 %v66_v47, 16  ;;  %v83_v0 = vshrl.u32 %v67_v48, 16 }
  0x1f   :  { %v84_v1 = vshrl.u32 %v68_v49, 16  ;;  %v85_v3 = vshrl.u32 %v69_v50, 16  ;;  %v86_v7 = vshrl.u32 %v70_v51, 16  ;;  %v87_v8 = vshrl.u32 %v71_v52, 16 }
  0x20   :  { %v88_v9 = vshrl.u32 %v72_v53, 16  ;;  %v89_v10 = vshrl.u32 %v73_v54, 16  ;;  %v90_v11 = vshrl.u32 %v74_v55, 16  ;;  %v91_v12 = vshrl.u32 %v75_v56, 16 }
  0x21   :  { %v92_v13 = vshrl.u32 %v76_v57, 16  ;;  %v93_v14 = vshrl.u32 %v77_v58, 16  ;;  %v94_v15 = vshrl.u32 %v78_v59, 16  ;;  %v95_v16 = vshrl.u32 %v79_v60, 16 }
  0x22   :  { %v96_v17 = vxor.u32 %v80_v61, %v64_v45  ;;  %v97_v18 = vxor.u32 %v81_v62, %v65_v46  ;;  %v98_v19 = vxor.u32 %v82_v63, %v66_v47  ;;  %v99_v5 = vxor.u32 %v83_v0, %v67_v48 }
  0x23   :  { %v100_v20 = vxor.u32 %v84_v1, %v68_v49  ;;  %v101_v21 = vxor.u32 %v85_v3, %v69_v50  ;;  %v102_v22 = vxor.u32 %v86_v7, %v70_v51  ;;  %v103_v23 = vxor.u32 %v87_v8, %v71_v52 }
  0x24   :  { %v104_v24 = vxor.u32 %v88_v9, %v72_v53  ;;  %v105_v29 = vxor.u32 %v89_v10, %v73_v54  ;;  %v106_v30 = vxor.u32 %v90_v11, %v74_v55  ;;  %v107_v31 = vxor.u32 %v91_v12, %v75_v56 }
  0x25   :  { %v108_v32 = vxor.u32 %v92_v13, %v76_v57  ;;  %v109_v33 = vxor.u32 %v93_v14, %v77_v58  ;;  %v110_v34 = vxor.u32 %v94_v15, %v78_v59  ;;  %v111_v35 = vxor.u32 %v95_v16, %v79_v60 }
  0x26   :  { %v112_v36 = vmul.u32 2246822507, %v96_v17  ;;  %v113_v37 = vmul.u32 2246822507, %v97_v18  ;;  %v561_v38 = vrot.slane %v552_v25, %v248_v27  ;;  %v566_v39 = vrot.slane %v552_v25, %v252_v28 }
  0x27   :  { %v114_v40 = vmul.u32 2246822507, %v98_v19  ;;  %v115_v41 = vmul.u32 2246822507, %v99_v5  ;;  %v256_v42 = vsub.s32 2, %v548_v4  ;;  %v260_v43 = vsub.s32 3, %v548_v4 }
  0x28   :  { %v116_v44 = vmul.u32 2246822507, %v100_v20  ;;  %v117_v45 = vmul.u32 2246822507, %v101_v21  ;;  %v128_v46 = vshrl.u32 %v112_v36, 13  ;;  %v129_v47 = vshrl.u32 %v113_v37, 13 }
  0x29   :  { %v118_v48 = vmul.u32 2246822507, %v102_v22  ;;  %v119_v49 = vmul.u32 2246822507, %v103_v23  ;;  %v130_v50 = vshrl.u32 %v114_v40, 13  ;;  %v131_v51 = vshrl.u32 %v115_v41, 13 }
  0x2a   :  { %v120_v52 = vmul.u32 2246822507, %v104_v24  ;;  %v121_v53 = vmul.u32 2246822507, %v105_v29  ;;  %v132_v54 = vshrl.u32 %v116_v44, 13  ;;  %v133_v55 = vshrl.u32 %v117_v45, 13 }
  0x2b   :  { %v122_v56 = vmul.u32 2246822507, %v106_v30  ;;  %v123_v57 = vmul.u32 2246822507, %v107_v31  ;;  %v134_v58 = vshrl.u32 %v118_v48, 13  ;;  %v135_v59 = vshrl.u32 %v119_v49, 13 }
  0x2c   :  { %v124_v60 = vmul.u32 2246822507, %v108_v32  ;;  %v125_v61 = vmul.u32 2246822507, %v109_v33  ;;  %v136_v62 = vshrl.u32 %v120_v52, 13  ;;  %v137_v63 = vshrl.u32 %v121_v53, 13 }
  0x2d   :  { %v126_v0 = vmul.u32 2246822507, %v110_v34  ;;  %v127_v1 = vmul.u32 2246822507, %v111_v35  ;;  %v138_v3 = vshrl.u32 %v122_v56, 13  ;;  %v139_v7 = vshrl.u32 %v123_v57, 13 }
  0x2e   :  { %v140_v8 = vshrl.u32 %v124_v60, 13  ;;  %v141_v9 = vshrl.u32 %v125_v61, 13  ;;  %v144_v10 = vxor.u32 %v128_v46, %v112_v36  ;;  %v145_v11 = vxor.u32 %v129_v47, %v113_v37 }
  0x2f   :  { %v142_v12 = vshrl.u32 %v126_v0, 13  ;;  %v143_v13 = vshrl.u32 %v127_v1, 13  ;;  %v146_v14 = vxor.u32 %v130_v50, %v114_v40  ;;  %v147_v15 = vxor.u32 %v131_v51, %v115_v41 }
  0x30   :  { %v148_v16 = vxor.u32 %v132_v54, %v116_v44  ;;  %v149_v17 = vxor.u32 %v133_v55, %v117_v45  ;;  %v150_v18 = vxor.u32 %v134_v58, %v118_v48  ;;  %v151_v19 = vxor.u32 %v135_v59, %v119_v49 }
  0x31   :  { %v152_v5 = vxor.u32 %v136_v62, %v120_v52  ;;  %v153_v20 = vxor.u32 %v137_v63, %v121_v53  ;;  %v154_v21 = vxor.u32 %v138_v3, %v122_v56  ;;  %v155_v22 = vxor.u32 %v139_v7, %v123_v57 }
  0x32   :  { %v156_v23 = vxor.u32 %v140_v8, %v124_v60  ;;  %v157_v24 = vxor.u32 %v141_v9, %v125_v61  ;;  %v158_v29 = vxor.u32 %v142_v12, %v126_v0  ;;  %v159_v30 = vxor.u32 %v143_v13, %v127_v1 }
  0x33   :  { %v160_v31 = vmul.u32 3266489909, %v144_v10  ;;  %v161_v32 = vmul.u32 3266489909, %v145_v11  ;;  %v573_v33 = vrot.slane %v552_v25, %v256_v42  ;;  %v578_v34 = vrot.slane %v552_v25, %v260_v43 }
  0x34   :  { %v162_v35 = vmul.u32 3266489909, %v146_v14  ;;  %v163_v36 = vmul.u32 3266489909, %v147_v15  ;;  %v264_v37 = vsub.s32 4, %v548_v4  ;;  %v268_v40 = vsub.s32 5, %v548_v4 }
  0x35   :  { %v164_v41 = vmul.u32 3266489909, %v148_v16  ;;  %v165_v44 = vmul.u32 3266489909, %v149_v17  ;;  %v176_v45 = vshrl.u32 %v160_v31, 16  ;;  %v177_v46 = vshrl.u32 %v161_v32, 16 }
  0x36   :  { %v166_v47 = vmul.u32 3266489909, %v150_v18  ;;  %v167_v48 = vmul.u32 3266489909, %v151_v19  ;;  %v178_v49 = vshrl.u32 %v162_v35, 16  ;;  %v179_v50 = vshrl.u32 %v163_v36, 16 }
  0x37   :  { %v168_v51 = vmul.u32 3266489909, %v152_v5  ;;  %v169_v52 = vmul.u32 3266489909, %v153_v20  ;;  %v180_v53 = vshrl.u32 %v164_v41, 16  ;;  %v181_v54 = vshrl.u32 %v165_v44, 16 }
  0x38   :  { %v170_v55 = vmul.u32 3266489909, %v154_v21  ;;  %v171_v56 = vmul.u32 3266489909, %v155_v22  ;;  %v182_v57 = vshrl.u32 %v166_v47, 16  ;;  %v183_v58 = vshrl.u32 %v167_v48, 16 }
  0x39   :  { %v172_v59 = vmul.u32 3266489909, %v156_v23  ;;  %v173_v60 = vmul.u32 3266489909, %v157_v24  ;;  %v184_v61 = vshrl.u32 %v168_v51, 16  ;;  %v185_v62 = vshrl.u32 %v169_v52, 16 }
  0x3a   :  { %v174_v63 = vmul.u32 3266489909, %v158_v29  ;;  %v175_v0 = vmul.u32 3266489909, %v159_v30  ;;  %v186_v1 = vshrl.u32 %v170_v55, 16  ;;  %v187_v3 = vshrl.u32 %v171_v56, 16 }
  0x3b   :  { %v188_v7 = vshrl.u32 %v172_v59, 16  ;;  %v189_v8 = vshrl.u32 %v173_v60, 16  ;;  %v192_v9 = vxor.u32 %v176_v45, %v160_v31  ;;  %v193_v10 = vxor.u32 %v177_v46, %v161_v32 }
  0x3c   :  { %v190_v11 = vshrl.u32 %v174_v63, 16  ;;  %v191_v12 = vshrl.u32 %v175_v0, 16  ;;  %v194_v13 = vxor.u32 %v178_v49, %v162_v35  ;;  %v195_v14 = vxor.u32 %v179_v50, %v163_v36 }
  0x3d   :  { %v196_v15 = vxor.u32 %v180_v53, %v164_v41  ;;  %v197_v16 = vxor.u32 %v181_v54, %v165_v44  ;;  %v198_v17 = vxor.u32 %v182_v57, %v166_v47  ;;  %v199_v18 = vxor.u32 %v183_v58, %v167_v48 }
  0x3e   :  { %v200_v19 = vxor.u32 %v184_v61, %v168_v51  ;;  %v201_v5 = vxor.u32 %v185_v62, %v169_v52  ;;  %v202_v20 = vxor.u32 %v186_v1, %v170_v55  ;;  %v203_v21 = vxor.u32 %v187_v3, %v171_v56 }
  0x3f   :  { %v204_v22 = vxor.u32 %v188_v7, %v172_v59  ;;  %v205_v23 = vxor.u32 %v189_v8, %v173_v60  ;;  %v206_v24 = vxor.u32 %v190_v11, %v174_v63  ;;  %v207_v29 = vxor.u32 %v191_v12, %v175_v0 }
  0x40   :  { %v208_v30 = vshrl.u32 %v192_v9, 8  ;;  %v209_v6 = vshrl.u32 %v193_v10, 8  ;;  %v210_v31 = vshrl.u32 %v194_v13, 8  ;;  %v211_v32 = vshrl.u32 %v195_v14, 8 }
  0x41   :  { %v212_v45 = vshrl.u32 %v196_v15, 8  ;;  %v213_v46 = vshrl.u32 %v197_v16, 8  ;;  %v214_v35 = vshrl.u32 %v198_v17, 8  ;;  %v215_v36 = vshrl.u32 %v199_v18, 8 }
  0x42   :  { %v216_v41 = vshrl.u32 %v200_v19, 8  ;;  %v217_v44 = vshrl.u32 %v201_v5, 8  ;;  %v218_v47 = vshrl.u32 %v202_v20, 8  ;;  %v219_v48 = vshrl.u32 %v203_v21, 8 }
  0x43   :  { %v220_v49 = vshrl.u32 %v204_v22, 8  ;;  %v221_v50 = vshrl.u32 %v205_v23, 8  ;;  %v222_v51 = vshrl.u32 %v206_v24, 8  ;;  %v223_v52 = vshrl.u32 %v207_v29, 8 }
  0x44   :  { %vm582_vm0 = vcmp.gt.s32.totalorder %v208_v30, 8388608  ;;  %vm586_vm1 = vcmp.gt.s32.totalorder %v209_v6, 8388608  ;;  %vm590_vm2 = vcmp.gt.s32.totalorder %v210_v31, 8388608  ;;  %vm594_vm3 = vcmp.gt.s32.totalorder %v211_v32, 8388608 }
  0x45   :  { %vm598_vm4 = vcmp.gt.s32.totalorder %v212_v45, 8388608  ;;  %vm602_vm5 = vcmp.gt.s32.totalorder %v213_v46, 8388608  ;;  %vm606_vm6 = vcmp.gt.s32.totalorder %v214_v35, 8388608  ;;  %vm610_vm7 = vcmp.gt.s32.totalorder %v215_v36, 8388608 }
  0x46   :  { %vm614_vm8 = vcmp.gt.s32.totalorder %v216_v41, 8388608  ;;  %vm618_vm9 = vcmp.gt.s32.totalorder %v217_v44, 8388608  ;;  %vm622_vm10 = vcmp.gt.s32.totalorder %v218_v47, 8388608  ;;  %vm626_vm11 = vcmp.gt.s32.totalorder %v219_v48, 8388608 }
  0x47   :  { %vm630_vm12 = vcmp.gt.s32.totalorder %v220_v49, 8388608  ;;  %vm634_vm13 = vcmp.gt.s32.totalorder %v221_v50, 8388608  ;;  %vm638_vm14 = vcmp.gt.s32.totalorder %v222_v51, 8388608  ;;  %vm642_vm15 = vcmp.gt.s32.totalorder %v223_v52, 8388608 }
  0x48   :  { %v265_v8 = vrot.slane %v552_v25, %v264_v37  ;;  %v269_v9 = vrot.slane %v552_v25, %v268_v40  ;;  %v272_v10 = vsub.s32 6, %v548_v4  ;;  %v276_v11 = vsub.s32 7, %v548_v4 }
  0x49   :  { %v281_v12 = vrot.slane %v554_v26, %v248_v27  ;;  %v285_v13 = vrot.slane %v554_v26, %v252_v28  ;;  %v289_v14 = vrot.slane %v554_v26, %v256_v42  ;;  %v293_v15 = vrot.slane %v554_v26, %v260_v43 }
  0x4a   :  { %v273_v16 = vrot.slane %v552_v25, %v272_v10  ;;  %v277_v17 = vrot.slane %v552_v25, %v276_v11  ;;  %v297_v27 = vrot.slane %v554_v26, %v264_v37  ;;  %v301_v28 = vrot.slane %v554_v26, %v268_v40 }
  0x4b   :  { %v305_v18 = vrot.slane %v554_v26, %v272_v10  ;;  %v309_v42 = vrot.slane %v554_v26, %v276_v11  ;;  %v326_v43 = vsel %vm582_vm0, %v561_v38, 0.0  ;;  %v327_v25 = vsel %vm586_vm1, %v566_v39, 0.0 }
  0x4c   :  { %v328_v37 = vsel %vm590_vm2, %v573_v33, 0.0  ;;  %v329_v40 = vsel %vm594_vm3, %v578_v34, 0.0  ;;  %v330_v19 = vsel %vm598_vm4, %v265_v8, 0.0  ;;  %v331_v26 = vsel %vm602_vm5, %v269_v9, 0.0 }
  0x4d   :  { %v332_v38 = vsel %vm606_vm6, %v273_v16, 0.0  ;;  %v333_v39 = vsel %vm610_vm7, %v277_v17, 0.0  ;;  %v334_v5 = vsel %vm614_vm8, %v281_v12, 0.0  ;;  %v335_v33 = vsel %vm618_vm9, %v285_v13, 0.0 }
  0x4e   :  { %v336_v34 = vsel %vm622_vm10, %v289_v14, 0.0  ;;  %v337_v20 = vsel %vm626_vm11, %v293_v15, 0.0  ;;  %v338_v21 = vsel %vm630_vm12, %v297_v27, 0.0  ;;  %v339_v22 = vsel %vm634_vm13, %v301_v28, 0.0 }
  0x4f   :  { %v340_v23 = vsel %vm638_vm14, %v305_v18, 0.0  ;;  %v341_v24 = vsel %vm642_vm15, %v309_v42, 0.0  ;;  %v358_v29 = vcombine.low %v326_v43, %v327_v25  ;;  %v359_v30 = vcombine.low %v328_v37, %v329_v40 }
  0x50   :  { %v360_v31 = vcombine.low %v330_v19, %v331_v26  ;;  %v361_v32 = vcombine.low %v332_v38, %v333_v39  ;;  %v753_v45 = vunpack.c.0.s8 %v546_v2  ;;  %v407_v35 = vcombine.low %v334_v5, %v335_v33 }
  0x51   :  { %v408_v36 = vcombine.low %v336_v34, %v337_v20  ;;  %v409_v41 = vcombine.low %v338_v21, %v339_v22  ;;  %v410_v44 = vcombine.low %v340_v23, %v341_v24 }
  0x52   :  { %v367_v46 = vsub.s32 %v753_v45, %v548_v4 }
  0x54   :  { %v368_v47 = vrot.slane %v358_v29, %v367_v46  ;;  %v375_v48 = vrot.slane %v359_v30, %v367_v46  ;;  %v382_v49 = vrot.slane %v360_v31, %v367_v46  ;;  %v389_v50 = vrot.slane %v361_v32, %v367_v46 }
  0x55   :  { %v417_v51 = vrot.slane %v407_v35, %v367_v46  ;;  %v424_v52 = vrot.slane %v408_v36, %v367_v46  ;;  %v431_v53 = vrot.slane %v409_v41, %v367_v46  ;;  %v438_v54 = vrot.slane %v410_v44, %v367_v46 }
  0x56   :  { %v390_v55 = vcombine.low %v368_v47, %v375_v48  ;;  %v391_v56 = vcombine.low %v382_v49, %v389_v50 }
  0x57   :  { %v439_v57 = vcombine.low %v417_v51, %v424_v52  ;;  %v440_v58 = vcombine.low %v431_v53, %v438_v54 }
  0x58   :  { %v398_v6 = vrot.slane %v390_v55, %v367_v46  ;;  %v405_v59 = vrot.slane %v391_v56, %v367_v46 }
  0x59   :  { %v447_v2 = vrot.slane %v439_v57, %v367_v46  ;;  %v454_v4 = vrot.slane %v440_v58, %v367_v46 }
  0x5a   :  { %v406_v60 = vcombine.low %v398_v6, %v405_v59 }
  0x5b   :  { %v455_v61 = vcombine.low %v447_v2, %v454_v4 }
  0x5c   :  { %458 = vst [vmem:[#allocation7] sm:$0xff] %v406_v60 }
  0x5d   :  { %459 = vst [vmem:[#allocation7 + $0x8] sm:$0xff] %v455_v61 }
  0x5e   :  { %509 = shalt.err (!%p506_p9)
}
  0x5f   :  { %469 = dma.vmem_to_hbm [thread:$0]  %s467_s1, 256, %s720_s2, [#allocation6]  }
  0x60   :  { %520 = dma.done.wait [#allocation6], 256  }
  0x61   :  { %521 = vsyncadd [#allocation6], 4294967040 }
  0x62   :  { %473 = vsyncpa [#allocation5], 1 }
  0x63   :  { %474 = vsyncpa [#allocation6], 1 }

</bundles_post_ra>
